<compile_context>
chip_gen: v5e
topology: v5e:2x2
jax: 0.10.0
libtpu: 0.0.40
codegen_flags: <defaults>
</compile_context>

<pallas_src>
import functools
import math

import jax
import jax.numpy as jnp
import numpy as np
from jax.experimental import pallas as pl
from jax.experimental.pallas import tpu as pltpu

EPS = 1e-20


def _cdiv(a, b):
    return -(-a // b)


def _round_up(a, b):
    return _cdiv(a, b) * b


def _tensorcores_per_chip():
    """TensorCores visible to one Pallas program (megacore). v7x exposes 2."""
    try:
        kind = jax.devices()[0].device_kind.lower()
    except Exception:
        return 1
    return 2 if "v7" in kind else 1


def _primary_caps_kernel(p_ref, w_ref, b_ref, sel_ref, o_ref):
    # p_ref:   (tile_r, pack*K)   packed im2col patch tile (compute dtype)
    # w_ref:   (pack*K, lanes)    block-diagonal conv weight, 1/NC folded in
    # b_ref:   (1, lanes)         f32 biases tiled over the pack slots
    # sel_ref: (lanes, lanes)     0/1 capsule-group selection matrix
    # o_ref:   (tile_r, lanes)    packed lane-dense output tile
    x = jnp.dot(p_ref[...], w_ref[...], preferred_element_type=jnp.float32)
    x = x + b_ref[...]
    # Squash: norm^2 over the num_capsule axis via an MXU matmul with the 0/1
    # group-selection matrix (stays 2D, no relayout). In the bf16 path both
    # operands are bf16 (the selector is exact in bf16), halving MXU passes.
    xx = (x * x).astype(sel_ref.dtype)
    n2 = jnp.dot(xx, sel_ref[...], preferred_element_type=jnp.float32)
    # n^2/((1+n^2)(n+eps)) == sqrt(n^2)/(1+n^2) up to eps; zero rows stay 0.
    scale = jnp.sqrt(n2) / (1.0 + n2)
    o_ref[...] = (x * scale).astype(o_ref.dtype)


def primary_caps_forward(x, kernel, biases, *, num_capsule, capsule_length,
                         kernel_size, stride, groups=1, padding=0,
                         out_capsule_last=True, tile_m=8192,
                         compute_dtype=jnp.bfloat16):
    """x: (B, C, H, W) NCHW. kernel: (NC*CL, C, k, k). biases: (NC, CL, 1, 1)."""
    if groups != 1:
        # TODO(synk): grouped convolution (groups > 1) is not implemented.
        raise NotImplementedError("groups != 1 is not supported")

    B, C = x.shape[0], x.shape[1]
    k = kernel_size
    oc = num_capsule * capsule_length
    cl = capsule_length
    K = C * k * k

    # ---- lane-packing geometry (always lane-dense, even if oc !| 128) ------
    if oc <= 128:
        oc_pad = next(d for d in (1, 2, 4, 8, 16, 32, 64, 128) if d >= oc)
        pack = 128 // oc_pad
    else:
        oc_pad = _round_up(oc, 128)
        pack = 1
    lanes = oc_pad * pack
    Kp = K * pack

    # ---- im2col, built NHWC-first directly in the packed layout ------------
    xd = jnp.transpose(x.astype(compute_dtype), (0, 2, 3, 1))   # small copy
    if padding:
        xd = jnp.pad(xd, ((0, 0), (padding, padding),
                          (padding, padding), (0, 0)))
    H, W = xd.shape[1], xd.shape[2]
    Ho = (H - k) // stride + 1
    Wo = (W - k) // stride + 1
    cols = []
    for dy in range(k):
        for dx in range(k):
            cols.append(xd[:, dy:dy + stride * Ho:stride,
                           dx:dx + stride * Wo:stride, :])
    patches = jnp.concatenate(cols, axis=-1)           # (B, Ho, Wo, k*k*C)
    M = B * Ho * Wo
    rows = _cdiv(M, pack)                              # packed rows w/ data

    # ---- tile / grid selection ---------------------------------------------
    granule = 16                               # sublane granule (f32 & bf16)
    cores = _tensorcores_per_chip()
    itemsize = jnp.dtype(compute_dtype).itemsize

    tile_r = max(tile_m // pack, granule)
    tile_r = _round_up(min(tile_r, _round_up(rows, granule)), granule)

    # Multi-TC chips (v7x): even step count, >= 2*cores when there is enough
    # work, so "parallel" sharding keeps both cores busy and each core still
    # overlaps DMA with compute. Single-TC chips never force a split.
    MIN_SPLIT = 128                            # packed rows per forced step
    if cores > 1 and rows >= cores * MIN_SPLIT:
        min_steps = 2 * cores if rows >= 2 * cores * MIN_SPLIT else cores
        steps = max(_round_up(_cdiv(rows, tile_r), cores), min_steps)
        tile_r = _round_up(_cdiv(rows, steps), granule)

    def _vmem_need(tr):
        lp = lambda n: _round_up(n, 128)       # VMEM lane padding
        return (2 * tr * lp(Kp) * itemsize            # double-buffered inputs
                + 2 * tr * lp(lanes) * itemsize       # double-buffered outputs
                + 2 * (lp(Kp) * lanes + lanes * lanes + lanes) * itemsize
                + 8 * tr * lp(lanes) * 4)             # f32 elementwise temps

    while tile_r > granule and _vmem_need(tile_r) > (40 << 20):
        tile_r = _round_up(tile_r // 2, granule)

    steps = _cdiv(rows, tile_r)
    rows_pad = steps * tile_r
    M_pad = rows_pad * pack
    vmem_limit = int(min(max(_vmem_need(tile_r) + (8 << 20), 32 << 20),
                         64 << 20))

    # ---- operands -----------------------------------------------------------
    patches = patches.reshape(M, K)                    # free reshape
    patches = jnp.pad(patches, ((0, M_pad - M), (0, 0)))   # pad rows: sliced off
    patches = patches.reshape(rows_pad, Kp)            # free reshape

    # Conv weight flattened to the (dy, dx, c) patch-column order, 1/NC folded
    # in, zero-padded to oc_pad channels, block-diagonal over the pack slots.
    w = kernel.transpose(2, 3, 1, 0).reshape(K, oc) / float(num_capsule)
    if oc_pad != oc:
        w = jnp.pad(w, ((0, 0), (0, oc_pad - oc)))
    w = w.astype(compute_dtype)
    w_big = jnp.kron(jnp.eye(pack, dtype=w.dtype), w) if pack > 1 else w

    b = biases.reshape(oc)
    if oc_pad != oc:
        b = jnp.pad(b, (0, oc_pad - oc))
    b_big = jnp.tile(b.reshape(1, oc_pad), (1, pack)).astype(jnp.float32)

    # Constant 0/1 capsule-group selection matrix: same pack slot and same
    # position inside the capsule -> same group (norm over the num_capsule
    # axis). Zero-padded channels contribute 0, so grouping stays correct.
    li = np.arange(lanes)
    sel = ((li[:, None] // oc_pad == li[None, :] // oc_pad) &
           (li[:, None] % cl == li[None, :] % cl))
    sel = jnp.asarray(sel, dtype=compute_dtype)

    out = pl.pallas_call(
        _primary_caps_kernel,
        out_shape=jax.ShapeDtypeStruct((rows_pad, lanes), compute_dtype),
        grid_spec=pltpu.PrefetchScalarGridSpec(
            num_scalar_prefetch=0,
            grid=(steps,),
            in_specs=[
                pl.BlockSpec((tile_r, Kp), lambda i: (i, 0)),
                pl.BlockSpec((Kp, lanes), lambda i: (0, 0)),
                pl.BlockSpec((1, lanes), lambda i: (0, 0)),
                pl.BlockSpec((lanes, lanes), lambda i: (0, 0)),
            ],
            out_specs=pl.BlockSpec((tile_r, lanes), lambda i: (i, 0)),
        ),
        compiler_params=pltpu.CompilerParams(
            dimension_semantics=("parallel",),
            vmem_limit_bytes=vmem_limit),
    )(patches, w_big, b_big, sel)

    out = out.reshape(rows_pad * pack, oc_pad)[:M, :oc]
    out = out.reshape(B, Ho, Wo, num_capsule, capsule_length)
    if not out_capsule_last:
        out = out.transpose(0, 3, 4, 1, 2)      # back to (B, NC, CL, Ho, Wo)
    return out


def _reference(x, kernel, biases, *, num_capsule, capsule_length, stride,
               padding):
    # Pure-JAX reference mirroring the PyTorch forward (out_capsule_last=True).
    out = jax.lax.conv_general_dilated(
        x, kernel, (stride, stride),
        [(padding, padding), (padding, padding)],
        dimension_numbers=('NCHW', 'OIHW', 'NCHW'))
    B, _, Ho, Wo = out.shape
    xr = out.reshape(B, num_capsule, capsule_length, Ho, Wo)
    xr = xr / num_capsule + biases.reshape(1, num_capsule, capsule_length, 1, 1)
    n = jnp.sqrt(jnp.sum(xr * xr, axis=1, keepdims=True))
    xr = (n ** 2 / (1 + n ** 2) / (n + EPS)) * xr
    return xr.transpose(0, 3, 4, 1, 2)


if __name__ == "__main__":
    # Small shapes consistent with the module.
    B, C, H, W = 2, 4, 16, 16
    num_capsule, capsule_length = 8, 4
    kernel_size, stride, padding = 3, 2, 0
    oc = num_capsule * capsule_length

    key = jax.random.PRNGKey(0)
    kx, kw, kb = jax.random.split(key, 3)

    x = jax.random.normal(kx, (B, C, H, W), dtype=jnp.float32)

    # Xavier/glorot uniform init (init_mode='glorot' default in the module).
    fan_in = C * kernel_size * kernel_size
    fan_out = oc * kernel_size * kernel_size
    bound = math.sqrt(6.0 / (fan_in + fan_out))
    kernel = jax.random.uniform(kw, (oc, C, kernel_size, kernel_size),
                                minval=-bound, maxval=bound, dtype=jnp.float32)
    # Small random biases (learnable param; exercises the bias-add path).
    biases = 0.05 * jax.random.normal(
        kb, (num_capsule, capsule_length, 1, 1), dtype=jnp.float32)

    ref = _reference(x, kernel, biases, num_capsule=num_capsule,
                     capsule_length=capsule_length, stride=stride,
                     padding=padding)

    common = dict(num_capsule=num_capsule, capsule_length=capsule_length,
                  kernel_size=kernel_size, stride=stride, padding=padding,
                  out_capsule_last=True)

    # Strict f32 path: tight match with the reference.
    fwd_f32 = jax.jit(functools.partial(primary_caps_forward,
                                        compute_dtype=jnp.float32, **common))
    out_f32 = jax.block_until_ready(fwd_f32(x, kernel, biases))
    np.testing.assert_allclose(np.asarray(out_f32), np.asarray(ref),
                               rtol=1e-5, atol=1e-5)
    assert out_f32.shape == (B, 7, 7, num_capsule, capsule_length)

    # Default bf16 path (all chips, incl. v5e): bf16 patches/weights/selector/
    # outputs with f32 accumulation and f32 squash math.
    fwd_bf16 = jax.jit(functools.partial(primary_caps_forward,
                                         compute_dtype=jnp.bfloat16, **common))
    out_bf16 = jax.block_until_ready(fwd_bf16(x, kernel, biases))
    assert out_bf16.dtype == jnp.bfloat16
    np.testing.assert_allclose(np.asarray(out_bf16.astype(jnp.float32)),
                               np.asarray(ref), rtol=3e-2, atol=3e-2)

    print("KERNEL_OK")
</pallas_src>

<mosaic_0001>
module attributes {stable_mosaic.version = 11 : i64} {
  func.func @_primary_caps_kernel(%arg0: i32, %arg1: memref<32x144xf32, #tpu.memory_space<vmem>>, %arg2: memref<144x128xf32, #tpu.memory_space<vmem>>, %arg3: memref<1x128xf32, #tpu.memory_space<vmem>>, %arg4: memref<128x128xf32, #tpu.memory_space<vmem>>, %arg5: memref<32x128xf32, #tpu.memory_space<vmem>>) attributes {dimension_semantics = [#tpu.dimension_semantics<parallel>], iteration_bounds = array<i64: 1>, scalar_prefetch = 0 : i64, scratch_operands = 0 : i64, tpu.core_type = #tpu.core_type<tc>, window_params = [{transform_indices = @transform_0, window_bounds = array<i64: 32, 144>}, {pipeline_mode = #tpu.pipeline_mode<synchronous>, transform_indices = @transform_1, window_bounds = array<i64: 144, 128>}, {pipeline_mode = #tpu.pipeline_mode<synchronous>, transform_indices = @transform_2, window_bounds = array<i64: 1, 128>}, {pipeline_mode = #tpu.pipeline_mode<synchronous>, transform_indices = @transform_3, window_bounds = array<i64: 128, 128>}, {transform_indices = @transform_4, window_bounds = array<i64: 32, 128>}]} {
    %c0 = arith.constant 0 : index
    %c0_0 = arith.constant 0 : index
    %0 = vector.load %arg1[%c0, %c0_0] : memref<32x144xf32, #tpu.memory_space<vmem>>, vector<32x144xf32>
    %c0_1 = arith.constant 0 : index
    %c0_2 = arith.constant 0 : index
    %1 = vector.load %arg2[%c0_1, %c0_2] : memref<144x128xf32, #tpu.memory_space<vmem>>, vector<144x128xf32>
    %cst = arith.constant dense<0.000000e+00> : vector<32x128xf32>
    %2 = tpu.matmul %0, %1, %cst {dimension_numbers = #tpu.dot_dimension_numbers<[1], [0], [0], [1], [0, 0, 1, 1], [], []>} : vector<32x144xf32>, vector<144x128xf32>, vector<32x128xf32> -> vector<32x128xf32>
    %c0_3 = arith.constant 0 : index
    %c0_4 = arith.constant 0 : index
    %3 = vector.load %arg3[%c0_3, %c0_4] : memref<1x128xf32, #tpu.memory_space<vmem>>, vector<1x128xf32>
    %4 = vector.broadcast %3 : vector<1x128xf32> to vector<32x128xf32>
    %5 = arith.addf %2, %4 : vector<32x128xf32>
    %6 = arith.mulf %5, %5 : vector<32x128xf32>
    %c0_5 = arith.constant 0 : index
    %c0_6 = arith.constant 0 : index
    %7 = vector.load %arg4[%c0_5, %c0_6] : memref<128x128xf32, #tpu.memory_space<vmem>>, vector<128x128xf32>
    %cst_7 = arith.constant dense<0.000000e+00> : vector<32x128xf32>
    %8 = tpu.matmul %6, %7, %cst_7 {dimension_numbers = #tpu.dot_dimension_numbers<[1], [0], [0], [1], [0, 0, 1, 1], [], []>} : vector<32x128xf32>, vector<128x128xf32>, vector<32x128xf32> -> vector<32x128xf32>
    %9 = math.sqrt %8 : vector<32x128xf32>
    %cst_8 = arith.constant 1.000000e+00 : f32
    %10 = vector.broadcast %cst_8 : f32 to vector<32x128xf32>
    %11 = arith.addf %10, %8 : vector<32x128xf32>
    %12 = arith.divf %9, %11 : vector<32x128xf32>
    %13 = arith.mulf %5, %12 : vector<32x128xf32>
    %c0_9 = arith.constant 0 : index
    %c0_10 = arith.constant 0 : index
    %14 = vector.load %arg5[%c0_9, %c0_10] : memref<32x128xf32, #tpu.memory_space<vmem>>, vector<32x128xf32>
    tpu.vector_store %arg5[%c0_9, %c0_10], %13 {strides = array<i32>} : memref<32x128xf32, #tpu.memory_space<vmem>>, vector<32x128xf32>,
    return
  }
  func.func @transform_0(%arg0: i32) -> (i32, i32) {
    %c0_i32 = arith.constant 0 : i32
    %c0_i32_0 = arith.constant 0 : i32
    return %arg0, %c0_i32 : i32, i32
  }
  func.func @transform_1(%arg0: i32) -> (i32, i32) {
    %c0_i32 = arith.constant 0 : i32
    %c0_i32_0 = arith.constant 0 : i32
    %c0_i32_1 = arith.constant 0 : i32
    return %c0_i32, %c0_i32_0 : i32, i32
  }
  func.func @transform_2(%arg0: i32) -> (i32, i32) {
    %c0_i32 = arith.constant 0 : i32
    %c0_i32_0 = arith.constant 0 : i32
    %c0_i32_1 = arith.constant 0 : i32
    return %c0_i32, %c0_i32_0 : i32, i32
  }
  func.func @transform_3(%arg0: i32) -> (i32, i32) {
    %c0_i32 = arith.constant 0 : i32
    %c0_i32_0 = arith.constant 0 : i32
    %c0_i32_1 = arith.constant 0 : i32
    return %c0_i32, %c0_i32_0 : i32, i32
  }
  func.func @transform_4(%arg0: i32) -> (i32, i32) {
    %c0_i32 = arith.constant 0 : i32
    %c0_i32_0 = arith.constant 0 : i32
    return %arg0, %c0_i32 : i32, i32
  }
}

</mosaic_0001>

<bundles_post_ra>
// kernel: primary_caps_forward.1
= control target key start
LH: loop header
LB: loop body
LE: loop exit
PB: predicated region body
PF: predicated region fallthrough
CT: control target
= control target key end

     0   :  { %vm47_vm0 = vcmask 130048   ;;  %s564_s1 = inlined_call_operand.vmem [shape: f32[144,128], index: 1, kind: input, shape index: {}]   ;;  %s565_s0 = inlined_call_operand.vmem [shape: f32[32,144], index: 0, kind: input, shape index: {}]   ;;  %s566_s2 = inlined_call_operand.vmem [shape: f32[1,128], index: 2, kind: input, shape index: {}]   ;;  %s567_s3 = inlined_call_operand.vmem [shape: f32[128,128], index: 3, kind: input, shape index: {}]   ;;  %s568_s4 = inlined_call_operand.vmem [shape: f32[32,128], index: 4, kind: output, shape index: {}]  }
   0x1   :  { %v40_v0 = vld [vmem:[%s564_s1 + $0x78] sm:$0xff]  ;;  %v39_v1 = vld [vmem:[%s564_s1 + $0x70] sm:$0xff]  ;;  %v38_v2 = vld [vmem:[%s564_s1 + $0x68] sm:$0xff] }
   0x2   :  { %60 = vmatpush.msra.mxu0 %v40_v0  ;;  %295 = vmatpush.msra.mxu3 %v40_v0  ;;  %v37_v3 = vld [vmem:[%s564_s1 + $0x60] sm:$0xff]  ;;  %v42_v4 = vld [vmem:[%s564_s1 + $0x88] sm:$0xff]  ;;  %v36_v6 = vld [vmem:[%s564_s1 + $0x58] sm:$0xff] }
   0x3   :  { %v41_v5 = vld [vmem:[%s564_s1 + $0x80] sm:$0xff]  ;;  %103 = vmatpush.msra.mxu1 %v42_v4  ;;  %v18_v7 = vld [vmem:[%s565_s0 + $0x8] sm:$0xff]  ;;  %v35_v8 = vld [vmem:[%s564_s1 + $0x50] sm:$0xff] }
   0x4   :  { %61 = vmatpush.msra.mxu0 %v39_v1  ;;  %296 = vmatpush.msra.mxu3 %v39_v1  ;;  %v34_v9 = vld [vmem:[%s564_s1 + $0x48] sm:$0xff]  ;;  %v33_v10 = vld [vmem:[%s564_s1 + $0x40] sm:$0xff]  ;;  %v32_v11 = vld [vmem:[%s564_s1 + $0x38] sm:$0xff] }
   0x5   :  { %104 = vmatpush.msra.mxu1 %v41_v5  ;;  %v20_v12 = vld [vmem:[%s565_s0 + $0x18] sm:$0xff]  ;;  %v31_v13 = vld [vmem:[%s564_s1 + $0x30] sm:$0xff]  ;;  %v30_v15 = vld [vmem:[%s564_s1 + $0x28] sm:$0xff] }
   0x6   :  { %62 = vmatpush.msra.mxu0 %v38_v2  ;;  %297 = vmatpush.msra.mxu3 %v38_v2  ;;  %v137_v14 = vld [vmem:[%s567_s3 + $0x78] sm:$0xff]  ;;  %v136_v16 = vld [vmem:[%s567_s3 + $0x70] sm:$0xff]  ;;  %v29_v17 = vld [vmem:[%s564_s1 + $0x20] sm:$0xff] }
   0x7   :  { %291 = vmatmul.msk.f32.vlgmr.msra.gmra.mxu1 %vm47_vm0, %v18_v7  ;;  %311 = vmatpush.msra.mxu2 %v137_v14  ;;  %v135_v18 = vld [vmem:[%s567_s3 + $0x68] sm:$0xff]  ;;  %v28_v19 = vld [vmem:[%s564_s1 + $0x18] sm:$0xff]  ;;  %v134_v21 = vld [vmem:[%s567_s3 + $0x60] sm:$0xff] }
   0x8   :  { %63 = vmatpush.msra.mxu0 %v37_v3  ;;  %298 = vmatpush.msra.mxu3 %v37_v3  ;;  %v22_v20 = vld [vmem:[%s565_s0 + $0x28] sm:$0xff]  ;;  %v27_v22 = vld [vmem:[%s564_s1 + $0x10] sm:$0xff]  ;;  %v133_v23 = vld [vmem:[%s567_s3 + $0x58] sm:$0xff] }
   0x9   :  { %138 = vmatpush.msrb.mxu1 %v137_v14  ;;  %312 = vmatpush.msra.mxu2 %v136_v16  ;;  %v26_v24 = vld [vmem:[%s564_s1 + $0x8] sm:$0xff]  ;;  %v132_v25 = vld [vmem:[%s567_s3 + $0x50] sm:$0xff]  ;;  %v25_v26 = vld [vmem:[%s564_s1] sm:$0xff] }
   0xa   :  { %64 = vmatpush.msra.mxu0 %v36_v6  ;;  %299 = vmatpush.msra.mxu3 %v36_v6  ;;  %v17_v27 = vld [vmem:[%s565_s0] sm:$0xff]  ;;  %v19_v28 = vld [vmem:[%s565_s0 + $0x10] sm:$0xff]  ;;  %v131_v29 = vld [vmem:[%s567_s3 + $0x48] sm:$0xff] }
   0xb   :  { %139 = vmatpush.msrb.mxu1 %v136_v16  ;;  %313 = vmatpush.msra.mxu2 %v135_v18  ;;  %v24_v30 = vld [vmem:[%s565_s0 + $0x38] sm:$0xff]  ;;  %v130_v31 = vld [vmem:[%s567_s3 + $0x40] sm:$0xff]  ;;  %v128_v33 = vld [vmem:[%s567_s3 + $0x30] sm:$0xff] }
   0xc   :  { %65 = vmatpush.msra.mxu0 %v35_v8  ;;  %300 = vmatpush.msra.mxu3 %v35_v8  ;;  %v129_v32 = vld [vmem:[%s567_s3 + $0x38] sm:$0xff]  ;;  %v21_v34 = vld [vmem:[%s565_s0 + $0x20] sm:$0xff]  ;;  %v127_v35 = vld [vmem:[%s567_s3 + $0x28] sm:$0xff] }
   0xd   :  { %140 = vmatpush.msrb.mxu1 %v135_v18  ;;  %314 = vmatpush.msra.mxu2 %v134_v21  ;;  %v126_v36 = vld [vmem:[%s567_s3 + $0x20] sm:$0xff]  ;;  %v23_v37 = vld [vmem:[%s565_s0 + $0x30] sm:$0xff]  ;;  %v125_v38 = vld [vmem:[%s567_s3 + $0x18] sm:$0xff] }
   0xe   :  { %66 = vmatpush.msra.mxu0 %v34_v9  ;;  %301 = vmatpush.msra.mxu3 %v34_v9  ;;  %v124_v39 = vld [vmem:[%s567_s3 + $0x10] sm:$0xff]  ;;  %v123_v40 = vld [vmem:[%s567_s3 + $0x8] sm:$0xff]  ;;  %v122_v41 = vld [vmem:[%s567_s3] sm:$0xff] }
   0xf   :  { %292 = vmatmul.msk.f32.gmra.mxu1 %vm47_vm0, %v20_v12  ;;  %315 = vmatpush.msra.mxu2 %v133_v23  ;;  %v327_v43 = vld [vmem:[%s566_s2] ss:$0 sm:$0xff] }
  0x10   :  { %67 = vmatpush.msra.mxu0 %v33_v10  ;;  %302 = vmatpush.msra.mxu3 %v33_v10 }
  0x11   :  { %141 = vmatpush.msrb.mxu1 %v134_v21  ;;  %316 = vmatpush.msra.mxu2 %v132_v25 }
  0x12   :  { %68 = vmatpush.msra.mxu0 %v32_v11  ;;  %303 = vmatpush.msra.mxu3 %v32_v11 }
  0x13   :  { %142 = vmatpush.msrb.mxu1 %v133_v23  ;;  %317 = vmatpush.msra.mxu2 %v131_v29 }
  0x14   :  { %69 = vmatpush.msra.mxu0 %v31_v13  ;;  %304 = vmatpush.msra.mxu3 %v31_v13 }
  0x15   :  { %143 = vmatpush.msrb.mxu1 %v132_v25  ;;  %318 = vmatpush.msra.mxu2 %v130_v31 }
  0x16   :  { %70 = vmatpush.msra.mxu0 %v30_v15  ;;  %305 = vmatpush.msra.mxu3 %v30_v15 }
  0x17   :  { %293 = vmatmul.msk.f32.gmra.mxu1 %vm47_vm0, %v22_v20  ;;  %319 = vmatpush.msra.mxu2 %v129_v32 }
  0x18   :  { %71 = vmatpush.msra.mxu0 %v29_v17  ;;  %306 = vmatpush.msra.mxu3 %v29_v17 }
  0x19   :  { %144 = vmatpush.msrb.mxu1 %v131_v29  ;;  %320 = vmatpush.msra.mxu2 %v128_v33 }
  0x1a   :  { %72 = vmatpush.msra.mxu0 %v28_v19  ;;  %307 = vmatpush.msra.mxu3 %v28_v19 }
  0x1b   :  { %145 = vmatpush.msrb.mxu1 %v130_v31  ;;  %321 = vmatpush.msra.mxu2 %v127_v35 }
  0x1c   :  { %73 = vmatpush.msra.mxu0 %v27_v22  ;;  %308 = vmatpush.msra.mxu3 %v27_v22 }
  0x1d   :  { %146 = vmatpush.msrb.mxu1 %v129_v32  ;;  %322 = vmatpush.msra.mxu2 %v126_v36 }
  0x1e   :  { %74 = vmatpush.msra.mxu0 %v26_v24  ;;  %309 = vmatpush.msra.mxu3 %v26_v24 }
  0x1f   :  { %294 = vmatmul.msk.f32.gmra.mxu1 %vm47_vm0, %v24_v30  ;;  %323 = vmatpush.msra.mxu2 %v125_v38 }
  0x20   :  { %75 = vmatpush.msra.mxu0 %v25_v26  ;;  %310 = vmatpush.msra.mxu3 %v25_v26 }
  0x21   :  { %76 = vmatmul.f32.vlgmr.msra.gmra.mxu0 %v17_v27  ;;  %79 = vmatmul.f32.vlgmr.msra.gmra.mxu3 %v19_v28 }
  0x22   :  { %147 = vmatpush.msrb.mxu1 %v128_v33  ;;  %324 = vmatpush.msra.mxu2 %v124_v39 }
  0x24   :  { %148 = vmatpush.msrb.mxu1 %v127_v35  ;;  %325 = vmatpush.msra.mxu2 %v123_v40 }
  0x26   :  { %149 = vmatpush.msrb.mxu1 %v126_v36  ;;  %326 = vmatpush.msra.mxu2 %v122_v41 }
  0x28   :  { %150 = vmatpush.msrb.mxu1 %v125_v38 }
  0x29   :  { %82 = vmatmul.f32.gmra.mxu3 %v21_v34 }
  0x2a   :  { %151 = vmatpush.msrb.mxu1 %v124_v39 }
  0x2c   :  { %152 = vmatpush.msrb.mxu1 %v123_v40 }
  0x2e   :  { %153 = vmatpush.msrb.mxu1 %v122_v41 }
  0x31   :  { %85 = vmatmul.f32.gmra.mxu3 %v23_v37 }
  0x84   :  { %v106_v42 = vpop.f32.mrf.mxu1 }
  0x8c   :  { %v109_v46 = vpop.f32.mrf.mxu1 }
  0x94   :  { %v112_v53 = vpop.f32.mrf.mxu1 }
  0x9c   :  { %v115_v59 = vpop.f32.mrf.mxu1 }
  0x9e   :  { %v77_v44 = vpop.f32.mrf.mxu0 }
  0x9f   :  { %v78_v45 = vadd.f32 %v327_v43, %v77_v44 }
  0xa1   :  { %v502_v47 = vadd.f32 %v106_v42, %v78_v45 }
  0xa3   :  { %v118_v48 = vmul.f32 %v502_v47, %v502_v47 }
  0xa4   :  { %v80_v49 = vpop.f32.mrf.mxu3 }
  0xa5   :  { %v81_v50 = vadd.f32 %v327_v43, %v80_v49  ;;  %154 = vmatmul.f32.vlgmr.msrb.gmra.mxu1 %v118_v48 }
  0xa7   :  { %v506_v51 = vadd.f32 %v109_v46, %v81_v50 }
  0xa9   :  { %v119_v52 = vmul.f32 %v506_v51, %v506_v51 }
  0xab   :  { %157 = vmatmul.f32.vlgmr.msra.gmra.mxu2 %v119_v52 }
  0xac   :  { %v83_v54 = vpop.f32.mrf.mxu3 }
  0xad   :  { %v84_v55 = vadd.f32 %v327_v43, %v83_v54 }
  0xaf   :  { %v510_v56 = vadd.f32 %v112_v53, %v84_v55 }
  0xb1   :  { %v120_v57 = vmul.f32 %v510_v56, %v510_v56 }
  0xb3   :  { %160 = vmatmul.f32.gmra.mxu2 %v120_v57 }
  0xb4   :  { %v86_v58 = vpop.f32.mrf.mxu3 }
  0xb5   :  { %v87_v60 = vadd.f32 %v327_v43, %v86_v58 }
  0xb7   :  { %v514_v61 = vadd.f32 %v115_v59, %v87_v60 }
  0xb9   :  { %v121_v62 = vmul.f32 %v514_v61, %v514_v61 }
  0xbb   :  { %163 = vmatmul.f32.gmra.mxu2 %v121_v62 }
 0x122   :  { %v155_v63 = vpop.f32.mrf.mxu1 }
 0x123   :  { %328 = vrsqrt.f32 %v155_v63  ;;  %v215_v0 = vadd.f32 1.0, %v155_v63  ;;  %vm174_vm4 = vcmp.eq.f32.partialorder %v155_v63, inf  ;;  %v177_v18 = vand.u32 2147483648, %v155_v63 }
 0x124   :  { %vm176_vm5 = vcmp.eq.f32.partialorder %v155_v63, 0.0 }
 0x125   :  { %330 = vrcp.f32 %v215_v0  ;;  %v230_v12 = vand.u32 2147483648, %v215_v0  ;;  %v228_v14 = vand.u32 2147483647, %v215_v0  ;;  %vm224_vm2 = vweird.f32 %v215_v0 }
 0x127   :  { %v231_v20 = vor.u32 1.1754944e-38, %v230_v12  ;;  %vm229_vm6 = vcmp.eq.f32.partialorder %v228_v14, 8.507059e+37 }
 0x129   :  { %v329_v1 = vpop.eup %328 }
 0x12a   :  { %v168_v2 = vmul.f32 %v329_v1, %v155_v63 }
 0x12b   :  { %v331_v3 = vpop.eup %330 }
 0x12c   :  { %v169_v4 = vmul.f32 %v329_v1, %v168_v2  ;;  %v220_v5 = vmul.f32 %v331_v3, %v215_v0  ;;  %vm225_vm1 = vweird.f32 %v331_v3 }
 0x12d   :  { %vm226_vm3 = vmor %vm224_vm2, %vm225_vm1 }
 0x12e   :  { %v170_v6 = vmul.f32 0.5, %v169_v4  ;;  %v518_v7 = vpop.f32.mrf.mxu2  ;;  %v221_v8 = vsub.f32 1.0, %v220_v5 }
 0x12f   :  { %332 = vrsqrt.f32 %v518_v7  ;;  %v216_v10 = vadd.f32 1.0, %v518_v7  ;;  %vm186_vm8 = vcmp.eq.f32.partialorder %v518_v7, inf  ;;  %vm188_vm10 = vcmp.eq.f32.partialorder %v518_v7, 0.0 }
 0x130   :  { %v171_v9 = vsub.f32 1.5, %v170_v6  ;;  %v222_v11 = vmul.f32 %v331_v3, %v221_v8 }
 0x131   :  { %334 = vrcp.f32 %v216_v10  ;;  %v245_v37 = vand.u32 2147483648, %v216_v10  ;;  %v243_v39 = vand.u32 2147483647, %v216_v10  ;;  %vm239_vm9 = vweird.f32 %v216_v10 }
 0x132   :  { %v172_v13 = vmul.f32 %v329_v1, %v171_v9  ;;  %v223_v15 = vadd.f32 %v331_v3, %v222_v11 }
 0x133   :  { %v246_v49 = vor.u32 1.1754944e-38, %v245_v37  ;;  %vm244_vm12 = vcmp.eq.f32.partialorder %v243_v39, 8.507059e+37 }
 0x134   :  { %v173_v16 = vmul.f32 %v172_v13, %v155_v63  ;;  %v227_v19 = vsel %vm226_vm3, %v331_v3, %v223_v15 }
 0x135   :  { %v333_v17 = vpop.eup %332  ;;  %v232_v25 = vsel %vm229_vm6, %v231_v20, %v227_v19 }
 0x136   :  { %v175_v21 = vsel %vm174_vm4, %v155_v63, %v173_v16  ;;  %v180_v22 = vmul.f32 %v333_v17, %v518_v7  ;;  %v523_v23 = vpop.f32.mrf.mxu2 }
 0x137   :  { %v178_v24 = vsel %vm176_vm5, %v177_v18, %v175_v21  ;;  %336 = vrsqrt.f32 %v523_v23  ;;  %v335_v26 = vpop.eup %334  ;;  %v217_v29 = vadd.f32 1.0, %v523_v23  ;;  %vm198_vm15 = vcmp.eq.f32.partialorder %v523_v23, inf }
 0x138   :  { %v233_v27 = vmul.f32 %v232_v25, %v178_v24  ;;  %v181_v28 = vmul.f32 %v333_v17, %v180_v22  ;;  %v235_v30 = vmul.f32 %v335_v26, %v216_v10  ;;  %vm240_vm7 = vweird.f32 %v335_v26 }
 0x139   :  { %338 = vrcp.f32 %v217_v29  ;;  %vm241_vm11 = vmor %vm239_vm9, %vm240_vm7  ;;  %v260_v63 = vand.u32 2147483648, %v217_v29  ;;  %v258_v2 = vand.u32 2147483647, %v217_v29  ;;  %vm254_vm14 = vweird.f32 %v217_v29 }
 0x13a   :  { %v279_v31 = vmul.f32 %v233_v27, %v502_v47  ;;  %v182_v32 = vmul.f32 0.5, %v181_v28  ;;  %v236_v33 = vsub.f32 1.0, %v235_v30  ;;  %v189_v47 = vand.u32 2147483648, %v518_v7 }
 0x13b   :  { %v201_v8 = vand.u32 2147483648, %v523_v23  ;;  %v261_v9 = vor.u32 1.1754944e-38, %v260_v63  ;;  %vm200_vm1 = vcmp.eq.f32.partialorder %v523_v23, 0.0  ;;  %vm259_vm2 = vcmp.eq.f32.partialorder %v258_v2, 8.507059e+37 }
 0x13c   :  { %283 = vst [vmem:[%s568_s4] sm:$0xff] %v279_v31  ;;  %v183_v34 = vsub.f32 1.5, %v182_v32  ;;  %v237_v36 = vmul.f32 %v335_v26, %v236_v33 }
 0x13d   :  { %v337_v35 = vpop.eup %336 }
 0x13e   :  { %v184_v38 = vmul.f32 %v333_v17, %v183_v34  ;;  %v192_v40 = vmul.f32 %v337_v35, %v523_v23  ;;  %v532_v41 = vpop.f32.mrf.mxu2  ;;  %v238_v42 = vadd.f32 %v335_v26, %v237_v36 }
 0x13f   :  { %340 = vrsqrt.f32 %v532_v41  ;;  %v339_v43 = vpop.eup %338  ;;  %v218_v46 = vadd.f32 1.0, %v532_v41  ;;  %vm210_vm6 = vcmp.eq.f32.partialorder %v532_v41, inf  ;;  %v213_v25 = vand.u32 2147483648, %v532_v41 }
 0x140   :  { %v185_v44 = vmul.f32 %v184_v38, %v518_v7  ;;  %v193_v45 = vmul.f32 %v337_v35, %v192_v40  ;;  %v242_v48 = vsel %vm241_vm11, %v335_v26, %v238_v42  ;;  %v250_v50 = vmul.f32 %v339_v43, %v217_v29 }
 0x141   :  { %342 = vrcp.f32 %v218_v46  ;;  %v247_v55 = vsel %vm244_vm12, %v246_v49, %v242_v48  ;;  %vm255_vm13 = vweird.f32 %v339_v43  ;;  %v275_v19 = vand.u32 2147483648, %v218_v46 }
 0x142   :  { %v187_v52 = vsel %vm186_vm8, %v518_v7, %v185_v44  ;;  %v194_v53 = vmul.f32 0.5, %v193_v45  ;;  %v251_v57 = vsub.f32 1.0, %v250_v50  ;;  %vm256_vm0 = vmor %vm254_vm14, %vm255_vm13  ;;  %v273_v22 = vand.u32 2147483647, %v218_v46 }
 0x143   :  { %v190_v54 = vsel %vm188_vm10, %v189_v47, %v187_v52  ;;  %vm269_vm4 = vweird.f32 %v218_v46  ;;  %v276_v27 = vor.u32 1.1754944e-38, %v275_v19  ;;  %vm212_vm7 = vcmp.eq.f32.partialorder %v532_v41, 0.0 }
 0x144   :  { %v248_v58 = vmul.f32 %v247_v55, %v190_v54  ;;  %v195_v59 = vsub.f32 1.5, %v194_v53  ;;  %v252_v62 = vmul.f32 %v339_v43, %v251_v57  ;;  %vm274_vm8 = vcmp.eq.f32.partialorder %v273_v22, 8.507059e+37 }
 0x145   :  { %v341_v60 = vpop.eup %340 }
 0x146   :  { %v280_v0 = vmul.f32 %v248_v58, %v506_v51  ;;  %v196_v1 = vmul.f32 %v337_v35, %v195_v59  ;;  %v204_v3 = vmul.f32 %v341_v60, %v532_v41  ;;  %v253_v4 = vadd.f32 %v339_v43, %v252_v62 }
 0x147   :  { %v343_v5 = vpop.eup %342 }
 0x148   :  { %284 = vst [vmem:[%s568_s4 + $0x8] sm:$0xff] %v280_v0  ;;  %v197_v6 = vmul.f32 %v196_v1, %v523_v23  ;;  %v205_v7 = vmul.f32 %v341_v60, %v204_v3  ;;  %v257_v51 = vsel %vm256_vm0, %v339_v43, %v253_v4  ;;  %v265_v10 = vmul.f32 %v343_v5, %v218_v46 }
 0x149   :  { %v262_v14 = vsel %vm259_vm2, %v261_v9, %v257_v51  ;;  %vm270_vm3 = vweird.f32 %v343_v5 }
 0x14a   :  { %v199_v11 = vsel %vm198_vm15, %v523_v23, %v197_v6  ;;  %v206_v12 = vmul.f32 0.5, %v205_v7  ;;  %v266_v15 = vsub.f32 1.0, %v265_v10  ;;  %vm271_vm5 = vmor %vm269_vm4, %vm270_vm3 }
 0x14b   :  { %v202_v13 = vsel %vm200_vm1, %v201_v8, %v199_v11 }
 0x14c   :  { %v263_v16 = vmul.f32 %v262_v14, %v202_v13  ;;  %v207_v17 = vsub.f32 1.5, %v206_v12  ;;  %v267_v18 = vmul.f32 %v343_v5, %v266_v15 }
 0x14e   :  { %v281_v20 = vmul.f32 %v263_v16, %v510_v56  ;;  %v208_v21 = vmul.f32 %v341_v60, %v207_v17  ;;  %v268_v24 = vadd.f32 %v343_v5, %v267_v18 }
 0x150   :  { %285 = vst [vmem:[%s568_s4 + $0x10] sm:$0xff] %v281_v20  ;;  %v209_v23 = vmul.f32 %v208_v21, %v532_v41  ;;  %v272_v26 = vsel %vm271_vm5, %v343_v5, %v268_v24 }
 0x151   :  { %v277_v29 = vsel %vm274_vm8, %v276_v27, %v272_v26 }
 0x152   :  { %v211_v28 = vsel %vm210_vm6, %v532_v41, %v209_v23 }
 0x153   :  { %v214_v56 = vsel %vm212_vm7, %v213_v25, %v211_v28 }
 0x154   :  { %v278_v30 = vmul.f32 %v277_v29, %v214_v56 }
 0x156   :  { %v282_v31 = vmul.f32 %v278_v30, %v514_v61 }
 0x158   :  { %286 = vst [vmem:[%s568_s4 + $0x18] sm:$0xff] %v282_v31 }

</bundles_post_ra>
